<compile_context>
chip_gen: v6e
topology: v6e:2x2x1
jax: 0.10.0
libtpu: 0.0.40
codegen_flags: <defaults>
</compile_context>

<pallas_src>
from types import SimpleNamespace

import jax
import jax.numpy as jnp
from jax.experimental import pallas as pl
from jax.experimental.pallas import tpu as pltpu

_LANES = 128
_VMEM_TILE_BUDGET = 4 * 1024 * 1024   # bytes per rk block buffer (double-buffered by Pallas)
_VMEM_LIMIT = 32 * 1024 * 1024        # explicit scoped-VMEM limit, safe on v5e / v6e / v7x


# ---------------------------------------------------------------------------
# shared math (used by the host-side mask precompute and the pure-JAX reference)
# ---------------------------------------------------------------------------
def _sigmoid(x):
    return 1.0 / (1.0 + jnp.exp(-x))


def _create_sigmoid_mask(x, a, b, m):
    # exact translation of RepresentationNet.create_sigmoid_mask
    normal_mask = (1.0 - _sigmoid(m * (x - a))) + _sigmoid(m * (x - b))
    shifted_mask1 = (1.0 - _sigmoid(m * (x - (a - 1.0)))) + _sigmoid(m * (x - (b - 1.0)))
    shifted_mask2 = (1.0 - _sigmoid(m * (x - (a + 1.0)))) + _sigmoid(m * (x - (b + 1.0)))
    return normal_mask * shifted_mask1 * shifted_mask2


# ---------------------------------------------------------------------------
# tiling helpers
# ---------------------------------------------------------------------------
def _divisors(n):
    return [d for d in range(1, n + 1) if n % d == 0]


def _choose_tiles(B, N, R, itemsize, budget=_VMEM_TILE_BUDGET):
    """Pick (TB, TR) divisors of (B, R) so one rk block (TB, N, TR, 128) fits the budget."""
    per_row = N * _LANES * itemsize                          # bytes of one (b, r) row
    tr_cands = [d for d in _divisors(R) if d % 8 == 0 or d == R]
    tr = R
    if per_row * R > budget:
        fits = [d for d in tr_cands if per_row * d <= budget]
        tr = max(fits) if fits else min(tr_cands)
    tb = 1
    for d in _divisors(B):
        if d * per_row * tr <= budget:
            tb = max(tb, d)
    return tb, tr


# ---------------------------------------------------------------------------
# Pallas kernels: fused aggregate() hot path (two gridded passes)
# ---------------------------------------------------------------------------
def aggregate_pallas(rk, mask_c, zero_mask_c):
    """rk: (B, N, C, H, W); mask_c, zero_mask_c: f32[C] -> rep (B, C, H, W)."""
    B, N, C, H, W = rk.shape
    F = C * H * W
    Fpad = ((F + _LANES - 1) // _LANES) * _LANES
    R = Fpad // _LANES
    pad = Fpad - F

    rk_flat = rk.reshape(B, N, F)
    if pad:
        # TODO(synk): padding costs one extra HBM copy of rk; only hit when C*H*W % 128 != 0.
        rk_flat = jnp.pad(rk_flat, ((0, 0), (0, 0), (0, pad)))
    rk_flat = rk_flat.reshape(B, N, R, _LANES)

    hw = H * W

    def to_lane_layout(m_c):
        # per-channel mask -> lane-dense (R, 128), matching the flattened rk layout
        m = jnp.broadcast_to(m_c.astype(jnp.float32)[:, None], (C, hw)).reshape(F)
        if pad:
            m = jnp.pad(m, (0, pad))
        return m.reshape(R, _LANES)

    mask_l = to_lane_layout(mask_c)                          # mask
    omm_l = to_lane_layout(1.0 - mask_c)                     # 1 - mask
    zm_l = to_lane_layout(zero_mask_c)                       # empty-partition mask

    TB, TR = _choose_tiles(B, N, R, jnp.dtype(rk.dtype).itemsize)
    nb, nr = B // TB, R // TR

    # ----- pass 1: observation mean (reduce over N) + cross-block batch-mean reduction ---
    def obs_mean_kernel(rk_ref, obs_ref, bm_ref, acc_ref):
        b = pl.program_id(1)

        @pl.when(b == 0)
        def _():
            acc_ref[...] = jnp.zeros_like(acc_ref)

        # stream the N axis one slice at a time (no full-tile materialization)
        obs_sum = rk_ref[:, 0].astype(jnp.float32)
        for n in range(1, N):
            obs_sum = obs_sum + rk_ref[:, n].astype(jnp.float32)
        obs_mean = obs_sum * (1.0 / N)
        obs_ref[...] = obs_mean

        # batch mean derived from observation_mean (uniform weights -> identical math)
        acc_ref[...] = acc_ref[...] + jnp.sum(obs_mean, axis=0)

        @pl.when(b == nb - 1)
        def _():
            bm_ref[...] = acc_ref[...] * (1.0 / B)

    obs_mean, batch_mean = pl.pallas_call(
        obs_mean_kernel,
        out_shape=(
            jax.ShapeDtypeStruct((B, R, _LANES), jnp.float32),
            jax.ShapeDtypeStruct((R, _LANES), jnp.float32),
        ),
        grid_spec=pltpu.PrefetchScalarGridSpec(
            num_scalar_prefetch=0,
            grid=(nr, nb),                                   # reduction (batch) axis last
            in_specs=[
                pl.BlockSpec((TB, N, TR, _LANES), lambda r, b: (b, 0, r, 0)),
            ],
            out_specs=[
                pl.BlockSpec((TB, TR, _LANES), lambda r, b: (b, r, 0)),
                pl.BlockSpec((TR, _LANES), lambda r, b: (r, 0)),
            ],
            scratch_shapes=[pltpu.VMEM((TR, _LANES), jnp.float32)],
        ),
        compiler_params=pltpu.CompilerParams(
            dimension_semantics=("parallel", "arbitrary"),
            vmem_limit_bytes=_VMEM_LIMIT,
        ),
    )(rk_flat)

    # ----- pass 2: tiny fully-parallel blend over observation_mean -----
    def blend_kernel(obs_ref, bm_ref, mask_ref, omm_ref, zm_ref, out_ref):
        blended = (omm_ref[...][None, :, :] * obs_ref[...]
                   + (mask_ref[...] * bm_ref[...])[None, :, :])
        out_ref[...] = (blended * zm_ref[...][None, :, :]).astype(out_ref.dtype)

    row_spec = pl.BlockSpec((TR, _LANES), lambda r, b: (r, 0))
    tile_spec = pl.BlockSpec((TB, TR, _LANES), lambda r, b: (b, r, 0))

    rep = pl.pallas_call(
        blend_kernel,
        out_shape=jax.ShapeDtypeStruct((B, R, _LANES), rk.dtype),
        grid_spec=pltpu.PrefetchScalarGridSpec(
            num_scalar_prefetch=0,
            grid=(nr, nb),
            in_specs=[tile_spec, row_spec, row_spec, row_spec, row_spec],
            out_specs=tile_spec,
        ),
        compiler_params=pltpu.CompilerParams(
            dimension_semantics=("parallel", "parallel"),
            vmem_limit_bytes=_VMEM_LIMIT,
        ),
    )(obs_mean, batch_mean, mask_l, omm_l, zm_l)

    rep = rep.reshape(B, Fpad)
    if pad:
        rep = rep[:, :F]
    return rep.reshape(B, C, H, W)


# ---------------------------------------------------------------------------
# Module wrapper (deterministic parameter init, host-side bookkeeping)
# ---------------------------------------------------------------------------
def make_settings():
    rep_cfg = SimpleNamespace(
        aggregation_func="mean",
        gradient_reg=0.0,
        start_sigmoid=20.0,
        end_sigmoid=100.0,
        sharp_sigmoid=1000.0,
        sharpening=10000,
        final_sharpening=10000,
    )
    return SimpleNamespace(
        latent_separation=True,
        adaptive_separation=True,
        empty_partition=True,
        partition_loss=1.0,
        model=SimpleNamespace(representations=[rep_cfg]),
    )


class RepresentationNet:
    def __init__(self, settings, index):
        cfg = settings.model.representations[index]
        self.aggr_func = cfg.aggregation_func
        self.latent_separation = settings.latent_separation
        self.adaptive_separation = settings.adaptive_separation
        self.empty_partition = settings.empty_partition
        self.partition_loss = settings.partition_loss
        self.gradient_reg = cfg.gradient_reg
        # deterministic parameter init: torch.ones(4 or 3)
        n_deltas = 4 if self.empty_partition else 3
        self.deltas = jnp.ones((n_deltas,), dtype=jnp.float32)
        self.representation = jnp.zeros([], dtype=jnp.float32)
        self.iteration = 0
        self.start_sigmoid = cfg.start_sigmoid
        self.end_sigmoid = cfg.end_sigmoid
        self.sharp_sigmoid = cfg.sharp_sigmoid
        self.sharpening = cfg.sharpening
        self.final_sharpening = cfg.final_sharpening

    # TODO(synk): prop() is abstract in the base RepresentationNet (returns None);
    # subclasses supply the encoder.  Treated as identity on the image tensor here.
    def prop(self, x, v):
        return x

    def get_multiplier(self):
        multiplier = max(
            self.start_sigmoid
            + (self.end_sigmoid - self.start_sigmoid) * self.iteration / self.sharpening,
            self.start_sigmoid,
        )
        if self.iteration > self.sharpening:
            multiplier = max(
                self.end_sigmoid
                + (self.sharp_sigmoid - self.end_sigmoid)
                * (self.iteration - self.sharpening) / self.final_sharpening,
                self.end_sigmoid,
            )
            multiplier = min(self.sharp_sigmoid, multiplier)
        return multiplier

    def forward(self, observation_images, observation_poses, factor):
        batch_size, num_observations = observation_images.shape[:2]
        img_dims = tuple(observation_images.shape[2:])
        pose_dims = tuple(observation_poses.shape[2:])
        x = observation_images.reshape((-1,) + img_dims)
        v = observation_poses.reshape((-1,) + pose_dims)
        rk = self.prop(x, v)
        r_dims = tuple(rk.shape[1:])
        rk = rk.reshape((batch_size, num_observations) + r_dims)
        return rk

    def aggregate(self, rk, factor):
        # configured path: latent_separation + adaptive_separation + empty_partition
        metrics = {}
        loss = {}
        r_dim = rk.shape[2]

        # parameter-only setup + O(C) sigmoid masks stay in plain JAX (tiny);
        # the big rk tensor is only touched inside the Pallas kernels.
        percentages = jax.nn.softmax(self.deltas)
        splits = jnp.cumsum(percentages)
        multiplier = self.get_multiplier()
        interp = jnp.cumsum(jnp.ones((r_dim,), dtype=jnp.float32) / r_dim)

        metrics["lighting_percentage"] = float(percentages[0])
        metrics["geometry_percentage"] = float(percentages[1])
        metrics["material_percentage"] = float(percentages[2])
        if self.empty_partition:
            metrics["empty_percentage"] = float(percentages[3])
            metrics["absolute_rsize"] = (1.0 - float(percentages[3])) * r_dim
        self.iteration += 1

        if factor == 0:
            a, b = jnp.float32(0.0), splits[0]
        elif factor == 1:
            a, b = splits[0], splits[1]
        else:
            a, b = splits[1], splits[2]

        mask_c = _create_sigmoid_mask(interp, a, b, jnp.float32(multiplier))
        if self.empty_partition:
            zero_c = jnp.clip(
                _create_sigmoid_mask(interp, splits[2], jnp.float32(1.0),
                                     jnp.float32(multiplier)),
                0.0, 1.0)
        else:
            zero_c = jnp.ones((r_dim,), dtype=jnp.float32)

        rep = aggregate_pallas(rk, mask_c, zero_c)
        self.representation = rep

        if self.empty_partition:
            loss["partition_loss"] = (
                self.partition_loss * r_dim / 256 * (1.0 - float(percentages[3]))
            )
        return rep, metrics, loss


# ---------------------------------------------------------------------------
# pure-JAX reference for validation
# ---------------------------------------------------------------------------
def reference_aggregate(rk, deltas, factor, multiplier):
    B, N, C, H, W = rk.shape
    percentages = jax.nn.softmax(deltas)
    splits = jnp.cumsum(percentages)
    interp = jnp.cumsum(jnp.ones((C,), dtype=rk.dtype) / C)
    if factor == 0:
        a, b = 0.0, splits[0]
    elif factor == 1:
        a, b = splits[0], splits[1]
    else:
        a, b = splits[1], splits[2]
    mask = _create_sigmoid_mask(interp, a, b, multiplier).reshape(1, C, 1, 1)
    batch_mean = jnp.mean(rk, axis=(0, 1), keepdims=True).reshape((-1, C, H, W))
    observation_mean = jnp.mean(rk, axis=1)
    rep = (1.0 - mask) * observation_mean + mask * batch_mean
    zero_mask = jnp.clip(
        _create_sigmoid_mask(interp, splits[2], 1.0, multiplier), 0.0, 1.0
    ).reshape(1, C, 1, 1)
    return rep * zero_mask


# ---------------------------------------------------------------------------
if __name__ == "__main__":
    key = jax.random.PRNGKey(0)
    B, N, C, H, W, P = 2, 3, 32, 8, 8, 7
    k1, k2 = jax.random.split(key)
    observation_images = jax.random.normal(k1, (B, N, C, H, W), dtype=jnp.float32)
    observation_poses = jax.random.normal(k2, (B, N, P), dtype=jnp.float32)
    factor = 1

    settings = make_settings()
    net = RepresentationNet(settings, 0)

    rk = net.forward(observation_images, observation_poses, factor)     # (B, N, C, H, W)
    rep, metrics, loss = net.aggregate(rk, factor)                      # (B, C, H, W)
    rep = jax.block_until_ready(rep)

    ref = reference_aggregate(rk, net.deltas, factor, net.start_sigmoid)
    max_err = float(jnp.max(jnp.abs(rep - ref)))
    assert rep.shape == (B, C, H, W), rep.shape
    assert max_err < 1e-5, f"mismatch vs reference: {max_err}"

    print("KERNEL_OK")
</pallas_src>

<mosaic_0001>
module attributes {stable_mosaic.version = 11 : i64} {
  func.func @obs_mean_kernel(%arg0: i32, %arg1: i32, %arg2: memref<2x3x16x128xf32, #tpu.memory_space<vmem>>, %arg3: memref<2x16x128xf32, #tpu.memory_space<vmem>>, %arg4: memref<16x128xf32, #tpu.memory_space<vmem>>, %arg5: memref<16x128xf32, #tpu.memory_space<vmem>>) attributes {dimension_semantics = [#tpu.dimension_semantics<parallel>, #tpu.dimension_semantics<arbitrary>], iteration_bounds = array<i64: 1, 1>, scalar_prefetch = 0 : i64, scratch_operands = 1 : i64, tpu.core_type = #tpu.core_type<tc>, window_params = [{transform_indices = @transform_0, window_bounds = array<i64: 2, 3, 16, 128>}, {transform_indices = @transform_1, window_bounds = array<i64: 2, 16, 128>}, {transform_indices = @transform_2, window_bounds = array<i64: 16, 128>}]} {
    %c0_i32 = arith.constant 0 : i32
    %0 = arith.cmpi eq, %arg1, %c0_i32 : i32
    %1 = arith.extui %0 : i1 to i32
    %c0_i32_0 = arith.constant 0 : i32
    %2 = arith.cmpi ne, %1, %c0_i32_0 : i32
    scf.if %2 {
      %cst_20 = arith.constant 0.000000e+00 : f32
      %21 = vector.broadcast %cst_20 : f32 to vector<16x128xf32>
      %c0_21 = arith.constant 0 : index
      %c0_22 = arith.constant 0 : index
      %22 = vector.load %arg5[%c0_21, %c0_22] : memref<16x128xf32, #tpu.memory_space<vmem>>, vector<16x128xf32>
      tpu.vector_store %arg5[%c0_21, %c0_22], %21 {strides = array<i32>} : memref<16x128xf32, #tpu.memory_space<vmem>>, vector<16x128xf32>,
    } else {
    }
    %c0 = arith.constant 0 : index
    %c0_1 = arith.constant 0 : index
    %c0_2 = arith.constant 0 : index
    %c0_3 = arith.constant 0 : index
    %3 = vector.load %arg2[%c0, %c0_1, %c0_2, %c0_3] : memref<2x3x16x128xf32, #tpu.memory_space<vmem>>, vector<2x1x16x128xf32>
    %4 = vector.shape_cast %3 : vector<2x1x16x128xf32> to vector<2x16x128xf32>
    %c0_4 = arith.constant 0 : index
    %c1 = arith.constant 1 : index
    %c0_5 = arith.constant 0 : index
    %c0_6 = arith.constant 0 : index
    %5 = vector.load %arg2[%c0_4, %c1, %c0_5, %c0_6] : memref<2x3x16x128xf32, #tpu.memory_space<vmem>>, vector<2x1x16x128xf32>
    %6 = vector.shape_cast %5 : vector<2x1x16x128xf32> to vector<2x16x128xf32>
    %7 = arith.addf %4, %6 : vector<2x16x128xf32>
    %c0_7 = arith.constant 0 : index
    %c2 = arith.constant 2 : index
    %c0_8 = arith.constant 0 : index
    %c0_9 = arith.constant 0 : index
    %8 = vector.load %arg2[%c0_7, %c2, %c0_8, %c0_9] : memref<2x3x16x128xf32, #tpu.memory_space<vmem>>, vector<2x1x16x128xf32>
    %9 = vector.shape_cast %8 : vector<2x1x16x128xf32> to vector<2x16x128xf32>
    %10 = arith.addf %7, %9 : vector<2x16x128xf32>
    %cst = arith.constant 0.333333343 : f32
    %11 = vector.broadcast %cst : f32 to vector<2x16x128xf32>
    %12 = arith.mulf %10, %11 : vector<2x16x128xf32>
    %c0_10 = arith.constant 0 : index
    %c0_11 = arith.constant 0 : index
    %c0_12 = arith.constant 0 : index
    %13 = vector.load %arg3[%c0_10, %c0_11, %c0_12] : memref<2x16x128xf32, #tpu.memory_space<vmem>>, vector<2x16x128xf32>
    tpu.vector_store %arg3[%c0_10, %c0_11, %c0_12], %12 {strides = array<i32>} : memref<2x16x128xf32, #tpu.memory_space<vmem>>, vector<2x16x128xf32>,
    %c0_13 = arith.constant 0 : index
    %c0_14 = arith.constant 0 : index
    %14 = vector.load %arg5[%c0_13, %c0_14] : memref<16x128xf32, #tpu.memory_space<vmem>>, vector<16x128xf32>
    %cst_15 = arith.constant dense<0.000000e+00> : vector<16x128xf32>
    %15 = vector.multi_reduction <add>, %12, %cst_15 [0] : vector<2x16x128xf32> to vector<16x128xf32>
    %16 = arith.addf %14, %15 : vector<16x128xf32>
    %c0_16 = arith.constant 0 : index
    %c0_17 = arith.constant 0 : index
    %17 = vector.load %arg5[%c0_16, %c0_17] : memref<16x128xf32, #tpu.memory_space<vmem>>, vector<16x128xf32>
    tpu.vector_store %arg5[%c0_16, %c0_17], %16 {strides = array<i32>} : memref<16x128xf32, #tpu.memory_space<vmem>>, vector<16x128xf32>,
    %c0_i32_18 = arith.constant 0 : i32
    %18 = arith.cmpi eq, %arg1, %c0_i32_18 : i32
    %19 = arith.extui %18 : i1 to i32
    %c0_i32_19 = arith.constant 0 : i32
    %20 = arith.cmpi ne, %19, %c0_i32_19 : i32
    scf.if %20 {
      %c0_20 = arith.constant 0 : index
      %c0_21 = arith.constant 0 : index
      %21 = vector.load %arg5[%c0_20, %c0_21] : memref<16x128xf32, #tpu.memory_space<vmem>>, vector<16x128xf32>
      %cst_22 = arith.constant 5.000000e-01 : f32
      %22 = vector.broadcast %cst_22 : f32 to vector<16x128xf32>
      %23 = arith.mulf %21, %22 : vector<16x128xf32>
      %c0_23 = arith.constant 0 : index
      %c0_24 = arith.constant 0 : index
      %24 = vector.load %arg4[%c0_23, %c0_24] : memref<16x128xf32, #tpu.memory_space<vmem>>, vector<16x128xf32>
      tpu.vector_store %arg4[%c0_23, %c0_24], %23 {strides = array<i32>} : memref<16x128xf32, #tpu.memory_space<vmem>>, vector<16x128xf32>,
    } else {
    }
    return
  }
  func.func @transform_0(%arg0: i32, %arg1: i32) -> (i32, i32, i32, i32) {
    %c0_i32 = arith.constant 0 : i32
    %c0_i32_0 = arith.constant 0 : i32
    %c0_i32_1 = arith.constant 0 : i32
    return %arg1, %c0_i32, %arg0, %c0_i32_0 : i32, i32, i32, i32
  }
  func.func @transform_1(%arg0: i32, %arg1: i32) -> (i32, i32, i32) {
    %c0_i32 = arith.constant 0 : i32
    %c0_i32_0 = arith.constant 0 : i32
    return %arg1, %arg0, %c0_i32 : i32, i32, i32
  }
  func.func @transform_2(%arg0: i32, %arg1: i32) -> (i32, i32) {
    %c0_i32 = arith.constant 0 : i32
    %c0_i32_0 = arith.constant 0 : i32
    return %arg0, %c0_i32 : i32, i32
  }
}

</mosaic_0001>

<bundles_post_ra>
// kernel: tpu_custom_call.1
= control target key start
LH: loop header
LB: loop body
LE: loop exit
PB: predicated region body
PF: predicated region fallthrough
CT: control target
= control target key end

     0   :  { %8 = vsyncpa [#allocation4], 0  ;;  %s221_s0 = inlined_call_operand.hbm [shape: f32[2,3,16,128], index: 0, kind: input, shape index: {}]   ;;  %s222_s1 = inlined_call_operand.hbm [shape: f32[2,16,128], index: 1, kind: output, shape index: {0}]   ;;  %s223_s2 = inlined_call_operand.hbm [shape: f32[16,128], index: 2, kind: output, shape index: {1}]  }
   0x1   :  { %9 = vsyncpa [#allocation5], 0 }
   0x2   :  { %10 = vsyncpa [#allocation8], 0  ;;  %s183_s9 = smov [#allocation3]  }
   0x3   :  { %s16_s10 = sshll.u32 %s183_s9, 4  ;;  %s17_s10 = int_to_ptr.vmem [resolvable:$true] %s16_s10 }
   0x4   :  { %s125_s11 = scalar_lea.vmem %s17_s10, 1536  ;;  %p130_p1 = scmp.lt.s32.totalorder %s17_s10, %s17_s10 }
   0x5   :  { %p126_p0 = scmp.ne.s32.totalorder %s17_s10, %s125_s11  ;;  %p131_p2 = scmp.lt.s32.totalorder %s125_s11, %s125_s11 }
   0x7   :  { %p132_p3 = por %p131_p2, %p130_p1 }
   0x9   :  { %p133_p4 = pnand %p132_p3, %p126_p0 }
   0xb   :  { %136 = shalt.err (!%p133_p4)
}
   0xc   :  { %s184_s12 = smov 128   ;;  %s185_s13 = smov 8  }
   0xd   :  { %22 = dma.hbm_to_vmem [thread:$0]  %s221_s0, 1536, %s17_s10, [#allocation4], %s184_s12, %s184_s12, %s185_s13  }
   0xe   :  { %177 = dma.done.wait [#allocation4], 1536  }
   0xf   :  { %178 = vsyncadd [#allocation4], 4294965760  ;;  %v32_v0 = vld [vmem:[#allocation3] sm:$0xff]  ;;  %v37_v1 = vld [vmem:[#allocation3 + $0x10] sm:$0xff]  ;;  %s186_s0 = smov [#allocation6]   ;;  %s187_s17 = smov [#allocation7]  }
  0x10   :  { %v46_v2 = vld [vmem:[#allocation3 + $0x20] sm:$0xff]  ;;  %v41_v3 = vadd.f32 %v37_v1, %v32_v0  ;;  %v33_v4 = vld [vmem:[#allocation3 + $0x8] sm:$0xff]  ;;  %v38_v5 = vld [vmem:[#allocation3 + $0x18] sm:$0xff]  ;;  %s84_s16 = sshll.u32 %s186_s0, 4  ;;  %s96_s18 = sshll.u32 %s187_s17, 4  ;;  %s85_s16 = int_to_ptr.vmem [resolvable:$true] %s84_s16  ;;  %s97_s18 = int_to_ptr.vmem [resolvable:$true] %s96_s18 }
  0x11   :  { %v47_v6 = vld [vmem:[#allocation3 + $0x28] sm:$0xff]  ;;  %v42_v7 = vadd.f32 %v38_v5, %v33_v4  ;;  %v34_v8 = vld [vmem:[#allocation3 + $0x30] sm:$0xff]  ;;  %v39_v9 = vld [vmem:[#allocation3 + $0x40] sm:$0xff]  ;;  %s137_s19 = scalar_lea.vmem %s85_s16, 512  ;;  %p142_p6 = scmp.lt.s32.totalorder %s85_s16, %s85_s16 }
  0x12   :  { %v48_v10 = vld [vmem:[#allocation3 + $0x50] sm:$0xff]  ;;  %v50_v11 = vadd.f32 %v46_v2, %v41_v3  ;;  %v43_v12 = vadd.f32 %v39_v9, %v34_v8  ;;  %v35_v13 = vld [vmem:[#allocation3 + $0x38] sm:$0xff]  ;;  %v40_v14 = vld [vmem:[#allocation3 + $0x48] sm:$0xff]  ;;  %p138_p5 = scmp.ne.s32.totalorder %s85_s16, %s137_s19  ;;  %p143_p7 = scmp.lt.s32.totalorder %s137_s19, %s137_s19 }
  0x13   :  { %v49_v15 = vld [vmem:[#allocation3 + $0x58] sm:$0xff]  ;;  %v51_v16 = vadd.f32 %v47_v6, %v42_v7  ;;  %v44_v17 = vadd.f32 %v40_v14, %v35_v13 }
  0x14   :  { %v54_v18 = vmul.f32 0.33333334, %v50_v11  ;;  %v52_v19 = vadd.f32 %v48_v10, %v43_v12  ;;  %p144_p8 = por %p143_p7, %p142_p6 }
  0x15   :  { %v55_v20 = vmul.f32 0.33333334, %v51_v16  ;;  %v53_v21 = vadd.f32 %v49_v15, %v44_v17 }
  0x16   :  { %58 = vst [vmem:[#allocation6] sm:$0xff] %v54_v18  ;;  %v56_v22 = vmul.f32 0.33333334, %v52_v19  ;;  %p145_p9 = pnand %p144_p8, %p138_p5 }
  0x17   :  { %59 = vst [vmem:[#allocation6 + $0x8] sm:$0xff] %v55_v20  ;;  %v57_v23 = vmul.f32 0.33333334, %v53_v21 }
  0x18   :  { %60 = vst [vmem:[#allocation6 + $0x10] sm:$0xff] %v56_v22  ;;  %v64_v24 = vadd.f32 %v56_v22, %v54_v18 }
  0x19   :  { %61 = vst [vmem:[#allocation6 + $0x18] sm:$0xff] %v57_v23  ;;  %v65_v25 = vadd.f32 %v57_v23, %v55_v20 }
  0x1a   :  { %v75_v26 = vmul.f32 0.5, %v64_v24 }
  0x1b   :  { %148 = shalt.err (!%p145_p9)
}
  0x1c   :  { %90 = dma.vmem_to_hbm [thread:$0]  %s85_s16, 512, %s222_s1, [#allocation5], %s184_s12, %s184_s12, %s185_s13   ;;  %v76_v27 = vmul.f32 0.5, %v65_v25  ;;  %77 = vst [vmem:[#allocation7] sm:$0xff] %v75_v26 }
  0x1d   :  { %s157_s22 = scalar_lea.vmem %s97_s18, 256  ;;  %p162_p11 = scmp.lt.s32.totalorder %s97_s18, %s97_s18 }
  0x1e   :  { %78 = vst [vmem:[#allocation7 + $0x8] sm:$0xff] %v76_v27  ;;  %p158_p10 = scmp.ne.s32.totalorder %s97_s18, %s157_s22  ;;  %p163_p12 = scmp.lt.s32.totalorder %s157_s22, %s157_s22 }
  0x20   :  { %p164_p13 = por %p163_p12, %p162_p11 }
  0x22   :  { %p165_p0 = pnand %p164_p13, %p158_p10 }
  0x24   :  { %168 = shalt.err (!%p165_p0)
}
  0x25   :  { %102 = dma.vmem_to_hbm [thread:$0]  %s97_s18, 256, %s223_s2, [#allocation8], %s184_s12, %s184_s12, %s185_s13  }
  0x26   :  { %179 = dma.done.wait [#allocation5], 512  }
  0x27   :  { %180 = vsyncadd [#allocation5], 4294966784 }
  0x28   :  { %181 = dma.done.wait [#allocation8], 256  }
  0x29   :  { %182 = vsyncadd [#allocation8], 4294967040 }
  0x2a   :  { %109 = vsyncpa [#allocation4], 1 }
  0x2b   :  { %110 = vsyncpa [#allocation5], 1 }
  0x2c   :  { %111 = vsyncpa [#allocation8], 1 }

</bundles_post_ra>
